<compile_context>
chip_gen: v5e
topology: v5e:2x2
jax: 0.10.0
libtpu: 0.0.40
codegen_flags: <defaults>
</compile_context>

<pallas_src>
import functools

import jax
import jax.numpy as jnp
from jax.experimental import pallas as pl
from jax.experimental.pallas import tpu as pltpu

LANE = 128           # TPU lane width; hidden/action dims are lane-padded to this
SUBLANE_BF16 = 16    # bf16 sublane packing: keep bf16 row counts 16-aligned
NEG_INF = -1e30      # logit bias for padded (non-existent) action columns


def _round_up(n, m):
    return ((n + m - 1) // m) * m


def actor_mlp_kernel(x_ref, w_ref, b_ref, out_ref, *, seg):
    """Fused MLP forward: 2 hidden ReLU layers + output softmax.

    x_ref  : (bb, d_in_pad)   bf16 activations (one batch tile)
    w_ref  : (seg[3], LANE)   bf16 packed, lane-padded weights
    b_ref  : (8, LANE)        f32 packed biases (rows 0..2 used)
    out_ref: (bb, LANE)       f32 lane-padded action probabilities
    """
    x = x_ref[...]            # already bf16 (cast once in the wrapper)
    b = b_ref[...]

    # Layer 1: Linear + ReLU (bf16 MXU matmul, f32 accumulation & epilogue)
    h = jnp.dot(x, w_ref[seg[0]:seg[1], :],
                preferred_element_type=jnp.float32)
    h = jnp.maximum(h + b[0:1, :], 0.0)

    # Layer 2: Linear + ReLU
    h = jnp.dot(h.astype(jnp.bfloat16), w_ref[seg[1]:seg[2], :],
                preferred_element_type=jnp.float32)
    h = jnp.maximum(h + b[1:2, :], 0.0)

    # Output layer: Linear + softmax.  Padded action columns have a -1e30
    # bias (and zero weight columns), so exp(logit - max) underflows to 0
    # and never pollutes the sum.
    logits = jnp.dot(h.astype(jnp.bfloat16), w_ref[seg[2]:seg[3], :],
                     preferred_element_type=jnp.float32)
    logits = logits + b[2:3, :]

    m = jnp.max(logits, axis=-1, keepdims=True)
    e = jnp.exp(logits - m)
    denom = jnp.sum(e, axis=-1, keepdims=True)
    # Exact divide: PPO ratio math needs properly normalized probabilities;
    # the approximate reciprocal's ~2^-12 error is not acceptable here.
    out_ref[...] = (e / denom).astype(out_ref.dtype)


def pack_params(w1, b1, w2, b2, w3, b3):
    """Pack (w1,b1,w2,b2,w3,b3) into one bf16 weight slab + one f32 bias slab.

    Weight slab rows: [w1 (d_in_pad) | w2 (LANE) | w3 (LANE)], all LANE wide.
    Hidden activations are LANE wide with zero padding, so w2/w3 segments are
    LANE rows tall (extra rows/cols are zeros -> math is unchanged).
    """
    d_in, h1 = w1.shape
    h2 = w2.shape[1]
    n_actions = w3.shape[1]
    assert max(h1, h2, n_actions) <= LANE
    d_in_pad = _round_up(d_in, SUBLANE_BF16)

    seg = (0, d_in_pad, d_in_pad + LANE, d_in_pad + 2 * LANE)

    w_packed = jnp.zeros((seg[3], LANE), jnp.float32)
    w_packed = w_packed.at[:d_in, :h1].set(w1)
    w_packed = w_packed.at[seg[1]:seg[1] + h1, :h2].set(w2)
    w_packed = w_packed.at[seg[2]:seg[2] + h2, :n_actions].set(w3)
    w_packed = w_packed.astype(jnp.bfloat16)

    b_packed = jnp.zeros((8, LANE), jnp.float32)
    b_packed = b_packed.at[0, :h1].set(b1.reshape(-1))
    b_packed = b_packed.at[1, :h2].set(b2.reshape(-1))
    b_packed = b_packed.at[2, :].set(NEG_INF)
    b_packed = b_packed.at[2, :n_actions].set(b3.reshape(-1))
    return w_packed, b_packed, seg, d_in_pad, n_actions


@functools.partial(jax.jit,
                   static_argnames=("seg", "d_in_pad", "n_actions", "block_b"))
def actor_forward(x, w_packed, b_packed, seg, d_in_pad, n_actions,
                  block_b=2048):
    """Policy forward: returns (batch, n_actions) action probabilities."""
    batch, d_in = x.shape

    # --- batch tiling ----------------------------------------------------
    batch16 = _round_up(batch, SUBLANE_BF16)     # bf16 sublane alignment
    bb = min(block_b, batch16)
    # v7x has 2 TensorCores and "parallel" only shards the grid axis: when
    # the batch is big enough, split it so the grid has >= 2 steps.
    # Neutral on 1-TC v5e/v6e.
    if batch16 >= 512 and bb >= batch16:
        bb = _round_up(pl.cdiv(batch16, 2), SUBLANE_BF16)
    batch_pad = _round_up(batch16, bb)

    # --- input staging ---------------------------------------------------
    # Cast once to bf16 (the MXU operand dtype) so the HBM read and the x
    # VMEM double-buffer are half width; skip the pad copy entirely when the
    # shape already matches the tile.
    if batch_pad == batch and d_in_pad == d_in:
        x_in = x.astype(jnp.bfloat16)
    else:
        x_in = jnp.zeros((batch_pad, d_in_pad), jnp.bfloat16)
        x_in = x_in.at[:batch, :d_in].set(x.astype(jnp.bfloat16))

    kernel = functools.partial(actor_mlp_kernel, seg=seg)
    out = pl.pallas_call(
        kernel,
        out_shape=jax.ShapeDtypeStruct((batch_pad, LANE), jnp.float32),
        grid=(batch_pad // bb,),
        in_specs=[
            pl.BlockSpec((bb, d_in_pad), lambda i: (i, 0)),
            pl.BlockSpec(w_packed.shape, lambda i: (0, 0)),   # grid-invariant
            pl.BlockSpec(b_packed.shape, lambda i: (0, 0)),   # grid-invariant
        ],
        out_specs=pl.BlockSpec((bb, LANE), lambda i: (i, 0)),
        compiler_params=pltpu.CompilerParams(
            dimension_semantics=("parallel",)),   # v7x: 2 TCs split the batch
    )(x_in, w_packed, b_packed)
    # Lane-dense output in-kernel; strip batch & action padding here.
    return out[:batch, :n_actions]


def init_params(key, layers):
    """Deterministic init mimicking PyTorch nn.Linear default (uniform)."""
    params = []
    for i in range(len(layers) - 1):
        fan_in, fan_out = layers[i], layers[i + 1]
        key, kw, kb = jax.random.split(key, 3)
        bound = 1.0 / jnp.sqrt(fan_in)
        w = jax.random.uniform(kw, (fan_in, fan_out), jnp.float32, -bound, bound)
        b = jax.random.uniform(kb, (fan_out,), jnp.float32, -bound, bound)
        params.extend([w, b])
    return params


def reference_forward_packed(x, w_packed, b_packed, seg, d_in_pad, n_actions):
    """Pure-JAX reference mirroring the kernel's bf16 matmul-operand rounding."""
    wf = w_packed.astype(jnp.float32)
    w1 = wf[seg[0]:seg[1]]
    w2 = wf[seg[1]:seg[2]]
    w3 = wf[seg[2]:seg[3]]
    b1, b2, b3 = b_packed[0], b_packed[1], b_packed[2]

    def q(a):  # bf16 round-trip (what the MXU operands see)
        return a.astype(jnp.bfloat16).astype(jnp.float32)

    xq = jnp.zeros((x.shape[0], d_in_pad), jnp.float32).at[:, :x.shape[1]].set(x)
    h = jnp.maximum(q(xq) @ w1 + b1, 0.0)
    h = jnp.maximum(q(h) @ w2 + b2, 0.0)
    logits = q(h) @ w3 + b3
    return jax.nn.softmax(logits, axis=-1)[:, :n_actions]


def reference_forward_f32(x, w1, b1, w2, b2, w3, b3):
    """Exact f32 reference (semantics of the original PyTorch module)."""
    h = jnp.maximum(x @ w1 + b1, 0.0)
    h = jnp.maximum(h @ w2 + b2, 0.0)
    return jax.nn.softmax(h @ w3 + b3, axis=-1)


if __name__ == "__main__":
    # obs_dim=32 state features, two hidden layers of 64, 4 discrete actions,
    # batch of 8 states.
    layers = [32, 64, 64, 4]
    batch = 8

    key = jax.random.PRNGKey(0)
    key, kx = jax.random.split(key)
    x = jax.random.normal(kx, (batch, layers[0]), jnp.float32)
    w1, b1, w2, b2, w3, b3 = init_params(key, layers)

    w_packed, b_packed, seg, d_in_pad, n_actions = pack_params(
        w1, b1, w2, b2, w3, b3)

    out = actor_forward(x, w_packed, b_packed, seg, d_in_pad, n_actions)
    out = jax.block_until_ready(out)
    assert out.shape == (batch, n_actions)

    # Rows are exact probability distributions (exact divide in the epilogue).
    assert jnp.allclose(jnp.sum(out, axis=-1), 1.0, atol=1e-5), \
        "softmax rows must sum to 1"

    # Tight check vs bf16-mirrored reference.
    ref_q = reference_forward_packed(x, w_packed, b_packed, seg, d_in_pad,
                                     n_actions)
    assert jnp.allclose(out, ref_q, atol=1e-3, rtol=1e-3), \
        "mismatch vs bf16-mirrored reference"

    # Loose check vs exact f32 module semantics (bf16 operand rounding only).
    ref_f32 = reference_forward_f32(x, w1, b1, w2, b2, w3, b3)
    assert jnp.allclose(out, ref_f32, atol=3e-2), "mismatch vs f32 reference"

    # Exercise the multi-tile "parallel" grid path with a tiny tile size.
    kx2 = jax.random.fold_in(kx, 1)
    xb = jax.random.normal(kx2, (40, layers[0]), jnp.float32)
    out_b = actor_forward(xb, w_packed, b_packed, seg, d_in_pad, n_actions,
                          block_b=16)
    out_b = jax.block_until_ready(out_b)
    assert out_b.shape == (40, n_actions)
    ref_b = reference_forward_packed(xb, w_packed, b_packed, seg, d_in_pad,
                                     n_actions)
    assert jnp.allclose(out_b, ref_b, atol=1e-3, rtol=1e-3)

    print("KERNEL_OK")
</pallas_src>

<mosaic_0001>
module attributes {stable_mosaic.version = 11 : i64} {
  func.func @actor_mlp_kernel(%arg0: i32, %arg1: memref<16x32xbf16, #tpu.memory_space<vmem>>, %arg2: memref<288x128xbf16, #tpu.memory_space<vmem>>, %arg3: memref<8x128xf32, #tpu.memory_space<vmem>>, %arg4: memref<16x128xf32, #tpu.memory_space<vmem>>) attributes {dimension_semantics = [#tpu.dimension_semantics<parallel>], iteration_bounds = array<i64: 1>, scalar_prefetch = 0 : i64, scratch_operands = 0 : i64, tpu.core_type = #tpu.core_type<tc>, window_params = [{transform_indices = @transform_0, window_bounds = array<i64: 16, 32>}, {pipeline_mode = #tpu.pipeline_mode<synchronous>, transform_indices = @transform_1, window_bounds = array<i64: 288, 128>}, {pipeline_mode = #tpu.pipeline_mode<synchronous>, transform_indices = @transform_2, window_bounds = array<i64: 8, 128>}, {transform_indices = @transform_3, window_bounds = array<i64: 16, 128>}]} {
    %c0 = arith.constant 0 : index
    %c0_0 = arith.constant 0 : index
    %0 = vector.load %arg1[%c0, %c0_0] : memref<16x32xbf16, #tpu.memory_space<vmem>>, vector<16x32xbf16>
    %c0_1 = arith.constant 0 : index
    %c0_2 = arith.constant 0 : index
    %1 = vector.load %arg3[%c0_1, %c0_2] : memref<8x128xf32, #tpu.memory_space<vmem>>, vector<8x128xf32>
    %c0_3 = arith.constant 0 : index
    %c0_4 = arith.constant 0 : index
    %2 = vector.load %arg2[%c0_3, %c0_4] : memref<288x128xbf16, #tpu.memory_space<vmem>>, vector<32x128xbf16>
    %cst = arith.constant dense<0.000000e+00> : vector<16x128xf32>
    %3 = tpu.matmul %0, %2, %cst {dimension_numbers = #tpu.dot_dimension_numbers<[1], [0], [0], [1], [0, 0, 1, 1], [], []>} : vector<16x32xbf16>, vector<32x128xbf16>, vector<16x128xf32> -> vector<16x128xf32>
    %4 = vector.extract_strided_slice %1 {offsets = [0, 0], sizes = [1, 128], strides = [1, 1]} : vector<8x128xf32> to vector<1x128xf32>
    %5 = vector.broadcast %4 : vector<1x128xf32> to vector<16x128xf32>
    %6 = arith.addf %3, %5 : vector<16x128xf32>
    %cst_5 = arith.constant 0.000000e+00 : f32
    %7 = vector.broadcast %cst_5 : f32 to vector<16x128xf32>
    %8 = arith.maximumf %6, %7 : vector<16x128xf32>
    %9 = arith.truncf %8 : vector<16x128xf32> to vector<16x128xbf16>
    %c32 = arith.constant 32 : index
    %c0_6 = arith.constant 0 : index
    %10 = vector.load %arg2[%c32, %c0_6] : memref<288x128xbf16, #tpu.memory_space<vmem>>, vector<128x128xbf16>
    %cst_7 = arith.constant dense<0.000000e+00> : vector<16x128xf32>
    %11 = tpu.matmul %9, %10, %cst_7 {dimension_numbers = #tpu.dot_dimension_numbers<[1], [0], [0], [1], [0, 0, 1, 1], [], []>} : vector<16x128xbf16>, vector<128x128xbf16>, vector<16x128xf32> -> vector<16x128xf32>
    %12 = vector.extract_strided_slice %1 {offsets = [1, 0], sizes = [1, 128], strides = [1, 1]} : vector<8x128xf32> to vector<1x128xf32>
    %13 = vector.broadcast %12 : vector<1x128xf32> to vector<16x128xf32>
    %14 = arith.addf %11, %13 : vector<16x128xf32>
    %cst_8 = arith.constant 0.000000e+00 : f32
    %15 = vector.broadcast %cst_8 : f32 to vector<16x128xf32>
    %16 = arith.maximumf %14, %15 : vector<16x128xf32>
    %17 = arith.truncf %16 : vector<16x128xf32> to vector<16x128xbf16>
    %c160 = arith.constant 160 : index
    %c0_9 = arith.constant 0 : index
    %18 = vector.load %arg2[%c160, %c0_9] : memref<288x128xbf16, #tpu.memory_space<vmem>>, vector<128x128xbf16>
    %cst_10 = arith.constant dense<0.000000e+00> : vector<16x128xf32>
    %19 = tpu.matmul %17, %18, %cst_10 {dimension_numbers = #tpu.dot_dimension_numbers<[1], [0], [0], [1], [0, 0, 1, 1], [], []>} : vector<16x128xbf16>, vector<128x128xbf16>, vector<16x128xf32> -> vector<16x128xf32>
    %20 = vector.extract_strided_slice %1 {offsets = [2, 0], sizes = [1, 128], strides = [1, 1]} : vector<8x128xf32> to vector<1x128xf32>
    %21 = vector.broadcast %20 : vector<1x128xf32> to vector<16x128xf32>
    %22 = arith.addf %19, %21 : vector<16x128xf32>
    %cst_11 = arith.constant dense<0xFF800000> : vector<16xf32>
    %23 = vector.multi_reduction <maximumf>, %22, %cst_11 [1] : vector<16x128xf32> to vector<16xf32>
    %24 = vector.shape_cast %23 : vector<16xf32> to vector<16x1xf32>
    %25 = vector.broadcast %24 : vector<16x1xf32> to vector<16x128xf32>
    %26 = arith.subf %22, %25 : vector<16x128xf32>
    %27 = math.exp %26 : vector<16x128xf32>
    %cst_12 = arith.constant dense<0.000000e+00> : vector<16xf32>
    %28 = vector.multi_reduction <add>, %27, %cst_12 [1] : vector<16x128xf32> to vector<16xf32>
    %29 = vector.shape_cast %28 : vector<16xf32> to vector<16x1xf32>
    %30 = vector.broadcast %29 : vector<16x1xf32> to vector<16x128xf32>
    %31 = arith.divf %27, %30 : vector<16x128xf32>
    %c0_13 = arith.constant 0 : index
    %c0_14 = arith.constant 0 : index
    %32 = vector.load %arg4[%c0_13, %c0_14] : memref<16x128xf32, #tpu.memory_space<vmem>>, vector<16x128xf32>
    tpu.vector_store %arg4[%c0_13, %c0_14], %31 {strides = array<i32>} : memref<16x128xf32, #tpu.memory_space<vmem>>, vector<16x128xf32>,
    return
  }
  func.func @transform_0(%arg0: i32) -> (i32, i32) {
    %c0_i32 = arith.constant 0 : i32
    %c0_i32_0 = arith.constant 0 : i32
    return %arg0, %c0_i32 : i32, i32
  }
  func.func @transform_1(%arg0: i32) -> (i32, i32) {
    %c0_i32 = arith.constant 0 : i32
    %c0_i32_0 = arith.constant 0 : i32
    %c0_i32_1 = arith.constant 0 : i32
    return %c0_i32, %c0_i32_0 : i32, i32
  }
  func.func @transform_2(%arg0: i32) -> (i32, i32) {
    %c0_i32 = arith.constant 0 : i32
    %c0_i32_0 = arith.constant 0 : i32
    %c0_i32_1 = arith.constant 0 : i32
    return %c0_i32, %c0_i32_0 : i32, i32
  }
  func.func @transform_3(%arg0: i32) -> (i32, i32) {
    %c0_i32 = arith.constant 0 : i32
    %c0_i32_0 = arith.constant 0 : i32
    return %arg0, %c0_i32 : i32, i32
  }
}

</mosaic_0001>

<bundles_post_ra>
// kernel: actor_forward.1
= control target key start
LH: loop header
LB: loop body
LE: loop exit
PB: predicated region body
PF: predicated region fallthrough
CT: control target
= control target key end

     0   :  { %8 = vsyncpa [#allocation3], 0  ;;  %s422_s15 = smov [#allocation2]   ;;  %s423_s17 = smov 64   ;;  %s460_s0 = inlined_call_operand.vmem [shape: bf16[16,32], index: 0, kind: input, shape index: {}]   ;;  %s461_s1 = inlined_call_operand.hbm [shape: bf16[288,128], index: 1, kind: input, shape index: {}]   ;;  %s462_s2 = inlined_call_operand.vmem [shape: f32[8,128], index: 2, kind: input, shape index: {}]   ;;  %s463_s3 = inlined_call_operand.vmem [shape: f32[16,128], index: 3, kind: output, shape index: {}]  }
   0x1   :  { %s15_s14 = sshll.u32 %s461_s1, 4  ;;  %s17_s16 = sshll.u32 %s422_s15, 4  ;;  %s16_s14 = int_to_ptr.hbm [resolvable:$true] %s15_s14  ;;  %s18_s16 = int_to_ptr.vmem [resolvable:$true] %s17_s16 }
   0x2   :  { %s424_s18 = smov 4  }
   0x3   :  { %23 = dma.hbm_to_vmem [thread:$0]  %s16_s14, 2304, %s18_s16, [#allocation3], %s423_s17, %s423_s17, %s424_s18  }
   0x4   :  { %420 = dma.done.wait [#allocation3], 2304  }
   0x5   :  { %421 = vsyncadd [#allocation3], 4294964992  ;;  %v368_v0 = vld [vmem:[#allocation2 + $0x8] sm:$0xff]  ;;  %v367_v2 = vld [vmem:[#allocation2] sm:$0xff]  ;;  %vm56_vm0 = vcmask 261120  }
   0x6   :  { %v376_v1 = vld [vmem:[#allocation2 + $0x48] sm:$0xff]  ;;  %66 = vmatpush.bf16.msra.mxu0 %v368_v0  ;;  %v375_v3 = vld [vmem:[#allocation2 + $0x40] sm:$0xff]  ;;  %v374_v5 = vld [vmem:[#allocation2 + $0x38] sm:$0xff] }
   0x7   :  { %142 = vmatpush.bf16.msra.mxu1 %v376_v1  ;;  %v366_v4 = vld [vmem:[%s460_s0] sm:$0xff]  ;;  %v373_v6 = vld [vmem:[#allocation2 + $0x30] sm:$0xff]  ;;  %v372_v7 = vld [vmem:[#allocation2 + $0x28] sm:$0xff] }
   0x8   :  { %v371_v8 = vld [vmem:[#allocation2 + $0x20] sm:$0xff]  ;;  %v370_v9 = vld [vmem:[#allocation2 + $0x18] sm:$0xff]  ;;  %v369_v10 = vld [vmem:[#allocation2 + $0x10] sm:$0xff] }
   0x9   :  { %v384_v11 = vld [vmem:[#allocation2 + $0x88] sm:$0xff]  ;;  %v383_v12 = vld [vmem:[#allocation2 + $0x80] sm:$0xff]  ;;  %v382_v13 = vld [vmem:[#allocation2 + $0x78] sm:$0xff] }
   0xa   :  { %67 = vmatpush.bf16.msra.mxu0 %v367_v2  ;;  %224 = vmatpush.bf16.msra.mxu2 %v384_v11  ;;  %v381_v14 = vld [vmem:[#allocation2 + $0x70] sm:$0xff]  ;;  %v33_v15 = vld [vmem:[%s462_s2] sm:$0xff]  ;;  %v380_v24 = vld [vmem:[#allocation2 + $0x68] sm:$0xff] }
   0xb   :  { %143 = vmatpush.bf16.msra.mxu1 %v375_v3  ;;  %v38_v17 = vperm.slane %v33_v15, 0  ;;  %v379_v25 = vld [vmem:[#allocation2 + $0x60] sm:$0xff]  ;;  %v378_v26 = vld [vmem:[#allocation2 + $0x58] sm:$0xff]  ;;  %v377_v27 = vld [vmem:[#allocation2 + $0x50] sm:$0xff]  ;;  %v93_v29 = vperm.slane %v33_v15, 1  ;;  %v175_v36 = vperm.slane %v33_v15, 2 }
   0xd   :  { %301 = vmatmul.msk.bf16.vlgmr.msra.gmra.mxu0 %vm56_vm0, %v366_v4 }
   0xe   :  { %225 = vmatpush.bf16.msra.mxu2 %v383_v12 }
   0xf   :  { %144 = vmatpush.bf16.msra.mxu1 %v374_v5 }
  0x12   :  { %226 = vmatpush.bf16.msra.mxu2 %v382_v13 }
  0x13   :  { %145 = vmatpush.bf16.msra.mxu1 %v373_v6 }
  0x16   :  { %227 = vmatpush.bf16.msra.mxu2 %v381_v14 }
  0x17   :  { %146 = vmatpush.bf16.msra.mxu1 %v372_v7 }
  0x1a   :  { %228 = vmatpush.bf16.msra.mxu2 %v380_v24 }
  0x1b   :  { %147 = vmatpush.bf16.msra.mxu1 %v371_v8 }
  0x1e   :  { %229 = vmatpush.bf16.msra.mxu2 %v379_v25 }
  0x1f   :  { %148 = vmatpush.bf16.msra.mxu1 %v370_v9 }
  0x22   :  { %230 = vmatpush.bf16.msra.mxu2 %v378_v26 }
  0x23   :  { %149 = vmatpush.bf16.msra.mxu1 %v369_v10 }
  0x26   :  { %231 = vmatpush.bf16.msra.mxu2 %v377_v27 }
  0x8a   :  { %v69_v16 = vpop.f32.mrf.mxu0 }
  0x8b   :  { %v70_v18 = vadd.f32 %v69_v16, %v38_v17 }
  0x8d   :  { %v74_v21 = vmax.f32 %v70_v18, 0.0 }
  0x92   :  { %v71_v19 = vpop.f32.mrf.mxu0 }
  0x93   :  { %v72_v20 = vadd.f32 %v71_v19, %v38_v17 }
  0x95   :  { %v75_v22 = vmax.f32 %v72_v20, 0.0 }
  0x97   :  { %v76_v23 = vpack.c.bf16 %v75_v22, %v74_v21 }
  0x99   :  { %150 = vmatmul.bf16.vlgmr.msra.gmra.mxu1 %v76_v23 }
 0x116   :  { %v151_v28 = vpop.f32.mrf.mxu1 }
 0x117   :  { %v152_v30 = vadd.f32 %v151_v28, %v93_v29 }
 0x119   :  { %v156_v33 = vmax.f32 %v152_v30, 0.0 }
 0x11e   :  { %v153_v31 = vpop.f32.mrf.mxu1 }
 0x11f   :  { %v154_v32 = vadd.f32 %v153_v31, %v93_v29 }
 0x121   :  { %v157_v34 = vmax.f32 %v154_v32, 0.0 }
 0x123   :  { %v158_v35 = vpack.c.bf16 %v157_v34, %v156_v33 }
 0x125   :  { %232 = vmatmul.bf16.vlgmr.msra.gmra.mxu2 %v158_v35 }
 0x1a8   :  { %v233_v37 = vpop.f32.mrf.mxu2 }
 0x1a9   :  { %v234_v38 = vadd.f32 %v233_v37, %v175_v36 }
 0x1ab   :  { %238 = vmax.xlane.f32.xlu0 %v234_v38 }
 0x1b0   :  { %v235_v39 = vpop.f32.mrf.mxu2 }
 0x1b1   :  { %v236_v40 = vadd.f32 %v235_v39, %v175_v36 }
 0x1b3   :  { %240 = vmax.xlane.f32.xlu0 %v236_v40 }
 0x21e   :  { %v239_v41 = vpop.xlane.xlu0 %238 }
 0x21f   :  { %v242_v42 = vsub.f32 %v234_v38, %v239_v41 }
 0x221   :  { %v244_v43 = vmul.f32 1.442695, %v242_v42 }
 0x223   :  { %388 = vpow2.f32 %v244_v43 }
 0x226   :  { %v241_v44 = vpop.xlane.xlu0 %240 }
 0x227   :  { %v243_v45 = vsub.f32 %v236_v40, %v241_v44 }
 0x229   :  { %v389_v46 = vpop.eup %388  ;;  %v246_v47 = vmul.f32 1.442695, %v243_v45 }
 0x22a   :  { %248 = vadd.xlane.f32.xlu1 %v389_v46 }
 0x22b   :  { %390 = vpow2.f32 %v246_v47 }
 0x231   :  { %v391_v48 = vpop.eup %390 }
 0x232   :  { %250 = vadd.xlane.f32.xlu1 %v391_v48 }
 0x29d   :  { %v249_v49 = vpop.xlane.xlu1 %248 }
 0x29e   :  { %392 = vrcp.f32 %v249_v49  ;;  %v263_v54 = vand.u32 2147483648, %v249_v49  ;;  %v261_v56 = vand.u32 2147483647, %v249_v49  ;;  %vm257_vm2 = vweird.f32 %v249_v49 }
 0x2a0   :  { %v264_v59 = vor.u32 1.1754944e-38, %v263_v54  ;;  %vm262_vm4 = vcmp.eq.f32.partialorder %v261_v56, 8.507059e+37 }
 0x2a4   :  { %v393_v50 = vpop.eup %392 }
 0x2a5   :  { %v253_v51 = vmul.f32 %v393_v50, %v249_v49  ;;  %v251_v52 = vpop.xlane.xlu1 %250  ;;  %vm258_vm1 = vweird.f32 %v393_v50 }
 0x2a6   :  { %394 = vrcp.f32 %v251_v52  ;;  %vm259_vm3 = vmor %vm257_vm2, %vm258_vm1  ;;  %v278_v1 = vand.u32 2147483648, %v251_v52  ;;  %v276_v3 = vand.u32 2147483647, %v251_v52  ;;  %vm272_vm6 = vweird.f32 %v251_v52 }
 0x2a7   :  { %v254_v53 = vsub.f32 1.0, %v253_v51 }
 0x2a8   :  { %v279_v5 = vor.u32 1.1754944e-38, %v278_v1  ;;  %vm277_vm8 = vcmp.eq.f32.partialorder %v276_v3, 8.507059e+37 }
 0x2a9   :  { %v255_v55 = vmul.f32 %v393_v50, %v254_v53 }
 0x2ab   :  { %v256_v57 = vadd.f32 %v393_v50, %v255_v55 }
 0x2ac   :  { %v395_v58 = vpop.eup %394 }
 0x2ad   :  { %v260_v60 = vsel %vm259_vm3, %v393_v50, %v256_v57  ;;  %v268_v61 = vmul.f32 %v395_v58, %v251_v52  ;;  %vm273_vm5 = vweird.f32 %v395_v58 }
 0x2ae   :  { %v265_v62 = vsel %vm262_vm4, %v264_v59, %v260_v60  ;;  %vm274_vm7 = vmor %vm272_vm6, %vm273_vm5 }
 0x2af   :  { %v266_v63 = vmul.f32 %v389_v46, %v265_v62  ;;  %v269_v0 = vsub.f32 1.0, %v268_v61 }
 0x2b1   :  { %282 = vst [vmem:[%s463_s3] sm:$0xff] %v266_v63  ;;  %v270_v2 = vmul.f32 %v395_v58, %v269_v0 }
 0x2b3   :  { %v271_v4 = vadd.f32 %v395_v58, %v270_v2 }
 0x2b5   :  { %v275_v6 = vsel %vm274_vm7, %v395_v58, %v271_v4 }
 0x2b6   :  { %v280_v7 = vsel %vm277_vm8, %v279_v5, %v275_v6 }
 0x2b7   :  { %v281_v8 = vmul.f32 %v391_v48, %v280_v7 }
 0x2b9   :  { %283 = vst [vmem:[%s463_s3 + $0x8] sm:$0xff] %v281_v8 }
 0x2ba   :  { %288 = vsyncpa [#allocation3], 1 }

</bundles_post_ra>
